<compile_context>
chip_gen: v5e
topology: v5e:2x2
jax: 0.10.0
libtpu: 0.0.40
codegen_flags: <defaults>
</compile_context>

<pallas_src>
import functools

import jax
import jax.numpy as jnp
from jax import lax
from jax.experimental import pallas as pl
from jax.experimental.pallas import tpu as pltpu

_LANE = 128
_VMEM = pl.BlockSpec(memory_space=pltpu.MemorySpace.VMEM)


def _round_up(n, m):
    return (n + m - 1) // m * m


# ----------------------------------------------------------------------------
# Fused kernel: fc1 -> BN -> (ReLU) -> weight-norm fc2
# ----------------------------------------------------------------------------
def _bottleneck_mlp_kernel(x_ref, w1_ref, b1_ref, gamma_ref, beta_ref,
                           v2_ref, g2_ref, b2_ref, out_ref,
                           *, bn_eps, use_bn, use_relu):
    x = x_ref[...]

    # fc1: (B, F) @ (F, H) + b1
    h = jnp.dot(x, w1_ref[...], preferred_element_type=jnp.float32) + b1_ref[...]

    if use_bn:
        # BatchNorm1d, training-mode batch statistics (biased variance).
        mean = jnp.mean(h, axis=0, keepdims=True)
        c = h - mean
        var = jnp.mean(c * c, axis=0, keepdims=True)
        h = c * (lax.rsqrt(var + bn_eps) * gamma_ref[...]) + beta_ref[...]

    if use_relu:
        h = jnp.maximum(h, 0.0)

    # TODO(synk): nn.Dropout(p=0.5) for type1='bn_relu_drop' (training mode) is
    # left as identity (eval-mode semantics).

    # weight_norm'd fc2: w2[:, c] = g[c] * v[:, c] / ||v[:, c]||
    v = v2_ref[...]
    col_sq = jnp.sum(v * v, axis=0, keepdims=True)
    w2 = v * (g2_ref[...] * lax.rsqrt(jnp.maximum(col_sq, 1e-24)))

    out_ref[...] = jnp.dot(h, w2, preferred_element_type=jnp.float32) + b2_ref[...]


def bottleneck_mlp_forward(x, params, *, type1="bn", bn_eps=1e-5):
    """Fused BottleNeckMLP forward.

    params:
      w1    : (feature_dim, bottleneck_dim)   fc1 weight (transposed vs torch)
      b1    : (bottleneck_dim,)               fc1 bias
      gamma : (bottleneck_dim,)               BN weight
      beta  : (bottleneck_dim,)               BN bias
      v2    : (bottleneck_dim, num_classes)   fc2 weight_v (transposed vs torch)
      g2    : (num_classes,)                  fc2 weight_g
      b2    : (num_classes,)                  fc2 bias
    """
    B, _ = x.shape
    bottleneck_dim = params["w1"].shape[1]
    num_classes = params["v2"].shape[1]

    # Pad the class axis to a lane-dense width so the output store is an
    # unmasked vst (padded weight/bias columns are zero -> padded outputs are
    # exactly zero and get sliced off).
    nc_pad = _round_up(num_classes, _LANE)
    pad = nc_pad - num_classes
    v2 = jnp.pad(params["v2"], ((0, 0), (0, pad)))
    g2 = jnp.pad(params["g2"], ((0, pad),)).reshape(1, nc_pad)
    b2 = jnp.pad(params["b2"], ((0, pad),)).reshape(1, nc_pad)

    b1 = params["b1"].reshape(1, bottleneck_dim)
    gamma = params["gamma"].reshape(1, bottleneck_dim)
    beta = params["beta"].reshape(1, bottleneck_dim)

    kernel = functools.partial(
        _bottleneck_mlp_kernel,
        bn_eps=float(bn_eps),
        use_bn=("bn" in type1),
        use_relu=("relu" in type1),
    )

    out_padded = pl.pallas_call(
        kernel,
        out_shape=jax.ShapeDtypeStruct((B, nc_pad), jnp.float32),
        in_specs=[_VMEM] * 8,
        out_specs=_VMEM,
    )(x.astype(jnp.float32), params["w1"], b1, gamma, beta, v2, g2, b2)

    return out_padded[:, :num_classes]


# ----------------------------------------------------------------------------
# Pure-JAX reference (same semantics) for verification
# ----------------------------------------------------------------------------
def _reference_forward(x, params, *, type1="bn", bn_eps=1e-5):
    h = x @ params["w1"] + params["b1"]
    if "bn" in type1:
        mean = jnp.mean(h, axis=0, keepdims=True)
        var = jnp.mean((h - mean) ** 2, axis=0, keepdims=True)
        h = (h - mean) / jnp.sqrt(var + bn_eps) * params["gamma"] + params["beta"]
    if "relu" in type1:
        h = jnp.maximum(h, 0.0)
    v = params["v2"]
    w2 = v * (params["g2"][None, :] / jnp.sqrt(jnp.maximum(jnp.sum(v * v, axis=0), 1e-24)))
    return h @ w2 + params["b2"]


# ----------------------------------------------------------------------------
# Deterministic parameter init (xavier-style for weights, per the module)
# ----------------------------------------------------------------------------
def init_params(key, feature_dim, bottleneck_dim, num_classes):
    k1, k2, k3, k4, k5, k6, k7 = jax.random.split(key, 7)
    s1 = (2.0 / (feature_dim + bottleneck_dim)) ** 0.5
    s2 = (2.0 / (bottleneck_dim + num_classes)) ** 0.5
    return {
        "w1": s1 * jax.random.normal(k1, (feature_dim, bottleneck_dim), jnp.float32),
        "b1": 0.01 * jax.random.normal(k2, (bottleneck_dim,), jnp.float32),
        "gamma": 1.0 + 0.02 * jax.random.normal(k3, (bottleneck_dim,), jnp.float32),
        "beta": 0.01 * jax.random.normal(k4, (bottleneck_dim,), jnp.float32),
        "v2": s2 * jax.random.normal(k5, (bottleneck_dim, num_classes), jnp.float32),
        "g2": jnp.abs(1.0 + 0.1 * jax.random.normal(k6, (num_classes,), jnp.float32)),
        "b2": 0.01 * jax.random.normal(k7, (num_classes,), jnp.float32),
    }


if __name__ == "__main__":
    B, feature_dim, bottleneck_dim, num_classes = 8, 256, 256, 16

    key = jax.random.PRNGKey(0)
    kp, kx = jax.random.split(key)
    params = init_params(kp, feature_dim, bottleneck_dim, num_classes)
    x = jax.random.normal(kx, (B, feature_dim), jnp.float32)

    out = bottleneck_mlp_forward(x, params, type1="bn")
    out = jax.block_until_ready(out)

    assert out.shape == (B, num_classes)

    ref = _reference_forward(x, params, type1="bn")
    assert jnp.allclose(out, ref, rtol=1e-4, atol=1e-4), (
        f"max abs err {float(jnp.max(jnp.abs(out - ref)))}")

    print("KERNEL_OK")
</pallas_src>

<mosaic_0001>
module attributes {stable_mosaic.version = 11 : i64} {
  func.func @_bottleneck_mlp_kernel(%arg0: memref<8x256xf32, #tpu.memory_space<vmem>>, %arg1: memref<256x256xf32, #tpu.memory_space<vmem>>, %arg2: memref<1x256xf32, #tpu.memory_space<vmem>>, %arg3: memref<1x256xf32, #tpu.memory_space<vmem>>, %arg4: memref<1x256xf32, #tpu.memory_space<vmem>>, %arg5: memref<256x128xf32, #tpu.memory_space<vmem>>, %arg6: memref<1x128xf32, #tpu.memory_space<vmem>>, %arg7: memref<1x128xf32, #tpu.memory_space<vmem>>, %arg8: memref<8x128xf32, #tpu.memory_space<vmem>>) attributes {dimension_semantics = [], scalar_prefetch = 0 : i64, scratch_operands = 0 : i64, tpu.core_type = #tpu.core_type<tc>} {
    %c0 = arith.constant 0 : index
    %c0_0 = arith.constant 0 : index
    %0 = vector.load %arg0[%c0, %c0_0] : memref<8x256xf32, #tpu.memory_space<vmem>>, vector<8x256xf32>
    %c0_1 = arith.constant 0 : index
    %c0_2 = arith.constant 0 : index
    %1 = vector.load %arg1[%c0_1, %c0_2] : memref<256x256xf32, #tpu.memory_space<vmem>>, vector<256x256xf32>
    %cst = arith.constant dense<0.000000e+00> : vector<8x256xf32>
    %2 = tpu.matmul %0, %1, %cst {dimension_numbers = #tpu.dot_dimension_numbers<[1], [0], [0], [1], [0, 0, 1, 1], [], []>} : vector<8x256xf32>, vector<256x256xf32>, vector<8x256xf32> -> vector<8x256xf32>
    %c0_3 = arith.constant 0 : index
    %c0_4 = arith.constant 0 : index
    %3 = vector.load %arg2[%c0_3, %c0_4] : memref<1x256xf32, #tpu.memory_space<vmem>>, vector<1x256xf32>
    %4 = vector.broadcast %3 : vector<1x256xf32> to vector<8x256xf32>
    %5 = arith.addf %2, %4 : vector<8x256xf32>
    %cst_5 = arith.constant dense<0.000000e+00> : vector<256xf32>
    %6 = vector.multi_reduction <add>, %5, %cst_5 [0] : vector<8x256xf32> to vector<256xf32>
    %7 = vector.shape_cast %6 : vector<256xf32> to vector<1x256xf32>
    %cst_6 = arith.constant 8.000000e+00 : f32
    %8 = vector.broadcast %cst_6 : f32 to vector<1x256xf32>
    %9 = arith.divf %7, %8 : vector<1x256xf32>
    %10 = vector.broadcast %9 : vector<1x256xf32> to vector<8x256xf32>
    %11 = arith.subf %5, %10 : vector<8x256xf32>
    %12 = arith.mulf %11, %11 : vector<8x256xf32>
    %cst_7 = arith.constant dense<0.000000e+00> : vector<256xf32>
    %13 = vector.multi_reduction <add>, %12, %cst_7 [0] : vector<8x256xf32> to vector<256xf32>
    %14 = vector.shape_cast %13 : vector<256xf32> to vector<1x256xf32>
    %cst_8 = arith.constant 8.000000e+00 : f32
    %15 = vector.broadcast %cst_8 : f32 to vector<1x256xf32>
    %16 = arith.divf %14, %15 : vector<1x256xf32>
    %cst_9 = arith.constant 9.99999974E-6 : f32
    %17 = vector.broadcast %cst_9 : f32 to vector<1x256xf32>
    %18 = arith.addf %16, %17 : vector<1x256xf32>
    %19 = math.rsqrt %18 : vector<1x256xf32>
    %c0_10 = arith.constant 0 : index
    %c0_11 = arith.constant 0 : index
    %20 = vector.load %arg3[%c0_10, %c0_11] : memref<1x256xf32, #tpu.memory_space<vmem>>, vector<1x256xf32>
    %21 = arith.mulf %19, %20 : vector<1x256xf32>
    %22 = vector.broadcast %21 : vector<1x256xf32> to vector<8x256xf32>
    %23 = arith.mulf %11, %22 : vector<8x256xf32>
    %c0_12 = arith.constant 0 : index
    %c0_13 = arith.constant 0 : index
    %24 = vector.load %arg4[%c0_12, %c0_13] : memref<1x256xf32, #tpu.memory_space<vmem>>, vector<1x256xf32>
    %25 = vector.broadcast %24 : vector<1x256xf32> to vector<8x256xf32>
    %26 = arith.addf %23, %25 : vector<8x256xf32>
    %c0_14 = arith.constant 0 : index
    %c0_15 = arith.constant 0 : index
    %27 = vector.load %arg5[%c0_14, %c0_15] : memref<256x128xf32, #tpu.memory_space<vmem>>, vector<256x128xf32>
    %28 = arith.mulf %27, %27 : vector<256x128xf32>
    %cst_16 = arith.constant dense<0.000000e+00> : vector<128xf32>
    %29 = vector.multi_reduction <add>, %28, %cst_16 [0] : vector<256x128xf32> to vector<128xf32>
    %30 = vector.shape_cast %29 : vector<128xf32> to vector<1x128xf32>
    %c0_17 = arith.constant 0 : index
    %c0_18 = arith.constant 0 : index
    %31 = vector.load %arg6[%c0_17, %c0_18] : memref<1x128xf32, #tpu.memory_space<vmem>>, vector<1x128xf32>
    %cst_19 = arith.constant 1.000000e-24 : f32
    %32 = vector.broadcast %cst_19 : f32 to vector<1x128xf32>
    %33 = arith.maximumf %30, %32 : vector<1x128xf32>
    %34 = math.rsqrt %33 : vector<1x128xf32>
    %35 = arith.mulf %31, %34 : vector<1x128xf32>
    %36 = vector.broadcast %35 : vector<1x128xf32> to vector<256x128xf32>
    %37 = arith.mulf %27, %36 : vector<256x128xf32>
    %cst_20 = arith.constant dense<0.000000e+00> : vector<8x128xf32>
    %38 = tpu.matmul %26, %37, %cst_20 {dimension_numbers = #tpu.dot_dimension_numbers<[1], [0], [0], [1], [0, 0, 1, 1], [], []>} : vector<8x256xf32>, vector<256x128xf32>, vector<8x128xf32> -> vector<8x128xf32>
    %c0_21 = arith.constant 0 : index
    %c0_22 = arith.constant 0 : index
    %39 = vector.load %arg7[%c0_21, %c0_22] : memref<1x128xf32, #tpu.memory_space<vmem>>, vector<1x128xf32>
    %40 = vector.broadcast %39 : vector<1x128xf32> to vector<8x128xf32>
    %41 = arith.addf %38, %40 : vector<8x128xf32>
    %c0_23 = arith.constant 0 : index
    %c0_24 = arith.constant 0 : index
    %42 = vector.load %arg8[%c0_23, %c0_24] : memref<8x128xf32, #tpu.memory_space<vmem>>, vector<8x128xf32>
    tpu.vector_store %arg8[%c0_23, %c0_24], %41 {strides = array<i32>} : memref<8x128xf32, #tpu.memory_space<vmem>>, vector<8x128xf32>,
    return
  }
}

</mosaic_0001>

<bundles_post_ra>
// kernel: tpu_custom_call.1
= control target key start
LH: loop header
LB: loop body
LE: loop exit
PB: predicated region body
PF: predicated region fallthrough
CT: control target
= control target key end

     0   :  { %13 = vsyncpa [#allocation3], 0  ;;  %s1003_s0 = inlined_call_operand.hbm [shape: f32[8,256], index: 0, kind: input, shape index: {}]   ;;  %s1004_s1 = inlined_call_operand.hbm [shape: f32[256,256], index: 1, kind: input, shape index: {}]   ;;  %s1005_s2 = inlined_call_operand.hbm [shape: f32[1,256], index: 2, kind: input, shape index: {}]   ;;  %s1006_s3 = inlined_call_operand.vmem [shape: f32[1,256], index: 3, kind: input, shape index: {}]   ;;  %s1007_s4 = inlined_call_operand.hbm [shape: f32[1,256], index: 4, kind: input, shape index: {}]   ;;  %s1008_s5 = inlined_call_operand.hbm [shape: f32[256,128], index: 5, kind: input, shape index: {}]   ;;  %s1009_s6 = inlined_call_operand.vmem [shape: f32[1,128], index: 6, kind: input, shape index: {}]   ;;  %s1010_s7 = inlined_call_operand.vmem [shape: f32[1,128], index: 7, kind: input, shape index: {}]   ;;  %s1011_s8 = inlined_call_operand.hbm [shape: f32[8,128], index: 8, kind: output, shape index: {}]  }
   0x1   :  { %14 = vsyncpa [#allocation6], 0 }
   0x2   :  { %15 = vsyncpa [#allocation9], 0  ;;  %s32_s29 = sshll.u32 %s1004_s1, 4  ;;  %s33_s29 = int_to_ptr.hbm [resolvable:$true] %s32_s29 }
   0x3   :  { %16 = vsyncpa [#allocation4], 0  ;;  %s720_s30 = smov [#allocation5]   ;;  %s59_s12 = sshll.u32 %s1007_s4, 4  ;;  %s60_s12 = int_to_ptr.hbm [resolvable:$true] %s59_s12 }
   0x4   :  { %s34_s9 = sshll.u32 %s720_s30, 4  ;;  %s721_s13 = smov 256   ;;  %s35_s9 = int_to_ptr.vmem [resolvable:$true] %s34_s9 }
   0x5   :  { %s722_s14 = smov 16   ;;  %s723_s15 = smov [#allocation8]  }
   0x6   :  { %40 = dma.hbm_to_vmem [thread:$0]  %s33_s29, 8192, %s35_s9, [#allocation6], %s721_s13, %s721_s13, %s722_s14  }
   0x7   :  { %s61_s16 = sshll.u32 %s723_s15, 4  ;;  %s22_s19 = sshll.u32 %s1003_s0, 4  ;;  %s62_s16 = int_to_ptr.vmem [resolvable:$true] %s61_s16  ;;  %s23_s19 = int_to_ptr.hbm [resolvable:$true] %s22_s19 }
   0x8   :  { %64 = dma.hbm_to_vmem [thread:$0]  %s60_s12, 32, %s62_s16, [#allocation9]  }
   0x9   :  { %s46_s21 = sshll.u32 %s1005_s2, 4  ;;  %s724_s22 = smov [#allocation2]   ;;  %s47_s21 = int_to_ptr.hbm [resolvable:$true] %s46_s21 }
   0xa   :  { %s24_s23 = sshll.u32 %s724_s22, 4  ;;  %s725_s4 = smov [#allocation7]   ;;  %s25_s23 = int_to_ptr.vmem [resolvable:$true] %s24_s23 }
   0xb   :  { %27 = dma.hbm_to_vmem [thread:$0]  %s23_s19, 256, %s25_s23, [#allocation3]  }
   0xc   :  { %s48_s24 = sshll.u32 %s725_s4, 4  ;;  %s69_s27 = sshll.u32 %s1008_s5, 4  ;;  %s49_s24 = int_to_ptr.vmem [resolvable:$true] %s48_s24  ;;  %s70_s27 = int_to_ptr.hbm [resolvable:$true] %s69_s27 }
   0xd   :  { %51 = dma.hbm_to_vmem [thread:$0]  %s47_s21, 32, %s49_s24, [#allocation6]  }
   0xe   :  { %s726_s0 = smov [#allocation10]   ;;  %s727_s29 = smov 128  }
   0xf   :  { %s71_s28 = sshll.u32 %s726_s0, 4  ;;  %s728_s30 = smov 8   ;;  %s72_s28 = int_to_ptr.vmem [resolvable:$true] %s71_s28 }
  0x10   :  { %77 = dma.hbm_to_vmem [thread:$0]  %s70_s27, 4096, %s72_s28, [#allocation9], %s727_s29, %s727_s29, %s728_s30  }
  0x11   :  { %712 = dma.done.wait [#allocation3], 256  }
  0x12   :  { %713 = vsyncadd [#allocation3], 4294967040 }
  0x13   :  { %714 = dma.done.wait [#allocation6], 8224  }
  0x14   :  { %715 = vsyncadd [#allocation6], 4294959072 }
  0x15   :  { %716 = dma.done.wait [#allocation9], 4128  }
  0x16   :  { %717 = vsyncadd [#allocation9], 4294963168  ;;  %v134_v0 = vld [vmem:[#allocation5 + $0xf0] sm:$0xff]  ;;  %v135_v1 = vld [vmem:[#allocation5 + $0xf8] sm:$0xff]  ;;  %s730_s11 = smov [#allocation11]   ;;  %s536_s15 = sshll.u32 %s1011_s8, 4  ;;  %s537_s15 = int_to_ptr.hbm [resolvable:$true] %s536_s15 }
  0x17   :  { %v132_v2 = vld [vmem:[#allocation5 + $0xe0] sm:$0xff]  ;;  %174 = vmatpush.msra.mxu0 %v134_v0  ;;  %214 = vmatpush.msra.mxu2 %v135_v1  ;;  %v166_v3 = vld [vmem:[#allocation5 + $0x1f0] sm:$0xff]  ;;  %v133_v4 = vld [vmem:[#allocation5 + $0xe8] sm:$0xff]  ;;  %s534_s12 = sshll.u32 %s730_s11, 4  ;;  %s535_s12 = int_to_ptr.vmem [resolvable:$true] %s534_s12 }
  0x18   :  { %v167_v5 = vld [vmem:[#allocation5 + $0x1f8] sm:$0xff]  ;;  %194 = vmatpush.msra.mxu1 %v166_v3  ;;  %v130_v6 = vld [vmem:[#allocation5 + $0xd0] sm:$0xff]  ;;  %v164_v7 = vld [vmem:[#allocation5 + $0x1e0] sm:$0xff] }
  0x19   :  { %234 = vmatpush.msra.mxu3 %v167_v5  ;;  %v131_v8 = vld [vmem:[#allocation5 + $0xd8] sm:$0xff]  ;;  %175 = vmatpush.msra.mxu0 %v132_v2  ;;  %v165_v9 = vld [vmem:[#allocation5 + $0x1e8] sm:$0xff]  ;;  %v162_v10 = vld [vmem:[#allocation5 + $0x1d0] sm:$0xff] }
  0x1a   :  { %215 = vmatpush.msra.mxu2 %v133_v4  ;;  %195 = vmatpush.msra.mxu1 %v164_v7  ;;  %v128_v11 = vld [vmem:[#allocation5 + $0xc0] sm:$0xff]  ;;  %v129_v12 = vld [vmem:[#allocation5 + $0xc8] sm:$0xff]  ;;  %v163_v13 = vld [vmem:[#allocation5 + $0x1d8] sm:$0xff] }
  0x1b   :  { %235 = vmatpush.msra.mxu3 %v165_v9  ;;  %176 = vmatpush.msra.mxu0 %v130_v6  ;;  %v160_v14 = vld [vmem:[#allocation5 + $0x1c0] sm:$0xff]  ;;  %v161_v15 = vld [vmem:[#allocation5 + $0x1c8] sm:$0xff]  ;;  %v126_v16 = vld [vmem:[#allocation5 + $0xb0] sm:$0xff] }
  0x1c   :  { %216 = vmatpush.msra.mxu2 %v131_v8  ;;  %196 = vmatpush.msra.mxu1 %v162_v10  ;;  %v127_v17 = vld [vmem:[#allocation5 + $0xb8] sm:$0xff]  ;;  %v158_v18 = vld [vmem:[#allocation5 + $0x1b0] sm:$0xff]  ;;  %v124_v20 = vld [vmem:[#allocation5 + $0xa0] sm:$0xff] }
  0x1d   :  { %236 = vmatpush.msra.mxu3 %v163_v13  ;;  %177 = vmatpush.msra.mxu0 %v128_v11  ;;  %v159_v19 = vld [vmem:[#allocation5 + $0x1b8] sm:$0xff]  ;;  %v125_v21 = vld [vmem:[#allocation5 + $0xa8] sm:$0xff]  ;;  %v156_v22 = vld [vmem:[#allocation5 + $0x1a0] sm:$0xff] }
  0x1e   :  { %217 = vmatpush.msra.mxu2 %v129_v12  ;;  %197 = vmatpush.msra.mxu1 %v160_v14  ;;  %v157_v23 = vld [vmem:[#allocation5 + $0x1a8] sm:$0xff]  ;;  %v122_v24 = vld [vmem:[#allocation5 + $0x90] sm:$0xff]  ;;  %v123_v25 = vld [vmem:[#allocation5 + $0x98] sm:$0xff] }
  0x1f   :  { %237 = vmatpush.msra.mxu3 %v161_v15  ;;  %178 = vmatpush.msra.mxu0 %v126_v16  ;;  %v154_v26 = vld [vmem:[#allocation5 + $0x190] sm:$0xff]  ;;  %v155_v27 = vld [vmem:[#allocation5 + $0x198] sm:$0xff]  ;;  %v120_v28 = vld [vmem:[#allocation5 + $0x80] sm:$0xff] }
  0x20   :  { %218 = vmatpush.msra.mxu2 %v127_v17  ;;  %198 = vmatpush.msra.mxu1 %v158_v18  ;;  %v121_v29 = vld [vmem:[#allocation5 + $0x88] sm:$0xff]  ;;  %v152_v30 = vld [vmem:[#allocation5 + $0x180] sm:$0xff]  ;;  %v118_v32 = vld [vmem:[#allocation5 + $0x70] sm:$0xff] }
  0x21   :  { %238 = vmatpush.msra.mxu3 %v159_v19  ;;  %179 = vmatpush.msra.mxu0 %v124_v20  ;;  %v153_v31 = vld [vmem:[#allocation5 + $0x188] sm:$0xff]  ;;  %v119_v33 = vld [vmem:[#allocation5 + $0x78] sm:$0xff]  ;;  %v150_v34 = vld [vmem:[#allocation5 + $0x170] sm:$0xff] }
  0x22   :  { %219 = vmatpush.msra.mxu2 %v125_v21  ;;  %199 = vmatpush.msra.mxu1 %v156_v22  ;;  %v151_v35 = vld [vmem:[#allocation5 + $0x178] sm:$0xff]  ;;  %v116_v36 = vld [vmem:[#allocation5 + $0x60] sm:$0xff]  ;;  %v117_v37 = vld [vmem:[#allocation5 + $0x68] sm:$0xff] }
  0x23   :  { %239 = vmatpush.msra.mxu3 %v157_v23  ;;  %180 = vmatpush.msra.mxu0 %v122_v24  ;;  %v148_v38 = vld [vmem:[#allocation5 + $0x160] sm:$0xff]  ;;  %v149_v39 = vld [vmem:[#allocation5 + $0x168] sm:$0xff]  ;;  %v114_v40 = vld [vmem:[#allocation5 + $0x50] sm:$0xff] }
  0x24   :  { %220 = vmatpush.msra.mxu2 %v123_v25  ;;  %200 = vmatpush.msra.mxu1 %v154_v26  ;;  %v115_v41 = vld [vmem:[#allocation5 + $0x58] sm:$0xff]  ;;  %v146_v42 = vld [vmem:[#allocation5 + $0x150] sm:$0xff]  ;;  %v112_v44 = vld [vmem:[#allocation5 + $0x40] sm:$0xff] }
  0x25   :  { %240 = vmatpush.msra.mxu3 %v155_v27  ;;  %181 = vmatpush.msra.mxu0 %v120_v28  ;;  %v147_v43 = vld [vmem:[#allocation5 + $0x158] sm:$0xff]  ;;  %v113_v45 = vld [vmem:[#allocation5 + $0x48] sm:$0xff]  ;;  %v144_v46 = vld [vmem:[#allocation5 + $0x140] sm:$0xff] }
  0x26   :  { %221 = vmatpush.msra.mxu2 %v121_v29  ;;  %201 = vmatpush.msra.mxu1 %v152_v30  ;;  %v145_v47 = vld [vmem:[#allocation5 + $0x148] sm:$0xff]  ;;  %v110_v48 = vld [vmem:[#allocation5 + $0x30] sm:$0xff]  ;;  %v111_v49 = vld [vmem:[#allocation5 + $0x38] sm:$0xff] }
  0x27   :  { %241 = vmatpush.msra.mxu3 %v153_v31  ;;  %182 = vmatpush.msra.mxu0 %v118_v32  ;;  %v142_v50 = vld [vmem:[#allocation5 + $0x130] sm:$0xff]  ;;  %v143_v51 = vld [vmem:[#allocation5 + $0x138] sm:$0xff]  ;;  %v108_v52 = vld [vmem:[#allocation5 + $0x20] sm:$0xff] }
  0x28   :  { %222 = vmatpush.msra.mxu2 %v119_v33  ;;  %202 = vmatpush.msra.mxu1 %v150_v34  ;;  %v109_v53 = vld [vmem:[#allocation5 + $0x28] sm:$0xff]  ;;  %v140_v54 = vld [vmem:[#allocation5 + $0x120] sm:$0xff]  ;;  %v106_v56 = vld [vmem:[#allocation5 + $0x10] sm:$0xff] }
  0x29   :  { %242 = vmatpush.msra.mxu3 %v151_v35  ;;  %183 = vmatpush.msra.mxu0 %v116_v36  ;;  %v141_v55 = vld [vmem:[#allocation5 + $0x128] sm:$0xff]  ;;  %v107_v57 = vld [vmem:[#allocation5 + $0x18] sm:$0xff]  ;;  %v138_v58 = vld [vmem:[#allocation5 + $0x110] sm:$0xff] }
  0x2a   :  { %223 = vmatpush.msra.mxu2 %v117_v37  ;;  %203 = vmatpush.msra.mxu1 %v148_v38  ;;  %v139_v59 = vld [vmem:[#allocation5 + $0x118] sm:$0xff]  ;;  %v104_v60 = vld [vmem:[#allocation5] sm:$0xff]  ;;  %v105_v61 = vld [vmem:[#allocation5 + $0x8] sm:$0xff] }
  0x2b   :  { %243 = vmatpush.msra.mxu3 %v149_v39  ;;  %184 = vmatpush.msra.mxu0 %v114_v40  ;;  %v102_v62 = vld [vmem:[#allocation2] sm:$0xff]  ;;  %v136_v63 = vld [vmem:[#allocation5 + $0x100] sm:$0xff]  ;;  %v137_v0 = vld [vmem:[#allocation5 + $0x108] sm:$0xff] }
  0x2c   :  { %224 = vmatpush.msra.mxu2 %v115_v41  ;;  %204 = vmatpush.msra.mxu1 %v146_v42  ;;  %v103_v1 = vld [vmem:[#allocation2 + $0x8] sm:$0xff]  ;;  %v791_v2 = vld [vmem:[#allocation10] sm:$0xff]  ;;  %v793_v3 = vld [vmem:[#allocation10 + $0x8] sm:$0xff] }
  0x2d   :  { %244 = vmatpush.msra.mxu3 %v147_v43  ;;  %185 = vmatpush.msra.mxu0 %v112_v44  ;;  %v367_v4 = vmul.f32 %v791_v2, %v791_v2  ;;  %v368_v5 = vmul.f32 %v793_v3, %v793_v3  ;;  %v799_v6 = vld [vmem:[#allocation10 + $0x10] sm:$0xff]  ;;  %v803_v9 = vld [vmem:[#allocation10 + $0x18] sm:$0xff]  ;;  %v807_v12 = vld [vmem:[#allocation10 + $0x20] sm:$0xff] }
  0x2e   :  { %225 = vmatpush.msra.mxu2 %v113_v45  ;;  %205 = vmatpush.msra.mxu1 %v144_v46  ;;  %v369_v7 = vmul.f32 %v799_v6, %v799_v6  ;;  %v370_v10 = vmul.f32 %v803_v9, %v803_v9  ;;  %v371_v13 = vmul.f32 %v807_v12, %v807_v12  ;;  %v811_v15 = vld [vmem:[#allocation10 + $0x28] sm:$0xff]  ;;  %v815_v18 = vld [vmem:[#allocation10 + $0x30] sm:$0xff]  ;;  %v819_v21 = vld [vmem:[#allocation10 + $0x38] sm:$0xff] }
  0x2f   :  { %245 = vmatpush.msra.mxu3 %v145_v47  ;;  %186 = vmatpush.msra.mxu0 %v110_v48  ;;  %v399_v8 = vadd.f32 %v368_v5, %v367_v4  ;;  %v372_v16 = vmul.f32 %v811_v15, %v811_v15  ;;  %v373_v19 = vmul.f32 %v815_v18, %v815_v18  ;;  %v823_v24 = vld [vmem:[#allocation10 + $0x40] sm:$0xff]  ;;  %v827_v27 = vld [vmem:[#allocation10 + $0x48] sm:$0xff]  ;;  %v831_v30 = vld [vmem:[#allocation10 + $0x50] sm:$0xff] }
  0x30   :  { %226 = vmatpush.msra.mxu2 %v111_v49  ;;  %206 = vmatpush.msra.mxu1 %v142_v50  ;;  %v374_v22 = vmul.f32 %v819_v21, %v819_v21  ;;  %v375_v25 = vmul.f32 %v823_v24, %v823_v24  ;;  %v376_v28 = vmul.f32 %v827_v27, %v827_v27  ;;  %v835_v33 = vld [vmem:[#allocation10 + $0x58] sm:$0xff]  ;;  %v839_v36 = vld [vmem:[#allocation10 + $0x60] sm:$0xff]  ;;  %v843_v39 = vld [vmem:[#allocation10 + $0x68] sm:$0xff] }
  0x31   :  { %246 = vmatpush.msra.mxu3 %v143_v51  ;;  %187 = vmatpush.msra.mxu0 %v108_v52  ;;  %v400_v11 = vadd.f32 %v399_v8, %v369_v7  ;;  %v377_v31 = vmul.f32 %v831_v30, %v831_v30  ;;  %v378_v34 = vmul.f32 %v835_v33, %v835_v33  ;;  %v847_v42 = vld [vmem:[#allocation10 + $0x70] sm:$0xff]  ;;  %v851_v45 = vld [vmem:[#allocation10 + $0x78] sm:$0xff]  ;;  %v855_v48 = vld [vmem:[#allocation10 + $0x80] sm:$0xff] }
  0x32   :  { %227 = vmatpush.msra.mxu2 %v109_v53  ;;  %207 = vmatpush.msra.mxu1 %v140_v54  ;;  %v379_v37 = vmul.f32 %v839_v36, %v839_v36  ;;  %v380_v40 = vmul.f32 %v843_v39, %v843_v39  ;;  %v381_v43 = vmul.f32 %v847_v42, %v847_v42  ;;  %v859_v51 = vld [vmem:[#allocation10 + $0x88] sm:$0xff]  ;;  %v863_v54 = vld [vmem:[#allocation10 + $0x90] sm:$0xff]  ;;  %v883_v8 = vld [vmem:[#allocation10 + $0xb8] sm:$0xff] }
  0x33   :  { %247 = vmatpush.msra.mxu3 %v141_v55  ;;  %188 = vmatpush.msra.mxu0 %v106_v56  ;;  %v401_v14 = vadd.f32 %v400_v11, %v370_v10  ;;  %v382_v46 = vmul.f32 %v851_v45, %v851_v45  ;;  %v383_v49 = vmul.f32 %v855_v48, %v855_v48  ;;  %v879_v4 = vld [vmem:[#allocation10 + $0xb0] sm:$0xff] }
  0x34   :  { %228 = vmatpush.msra.mxu2 %v107_v57  ;;  %208 = vmatpush.msra.mxu1 %v138_v58  ;;  %v384_v52 = vmul.f32 %v859_v51, %v859_v51  ;;  %v385_v55 = vmul.f32 %v863_v54, %v863_v54  ;;  %v867_v57 = vld [vmem:[#allocation10 + $0x98] sm:$0xff]  ;;  %v389_v5 = vmul.f32 %v879_v4, %v879_v4 }
  0x35   :  { %248 = vmatpush.msra.mxu3 %v139_v59  ;;  %189 = vmatpush.msra.mxu0 %v104_v60  ;;  %v402_v17 = vadd.f32 %v401_v14, %v371_v13  ;;  %v386_v58 = vmul.f32 %v867_v57, %v867_v57  ;;  %v871_v60 = vld [vmem:[#allocation10 + $0xa0] sm:$0xff]  ;;  %v390_v10 = vmul.f32 %v883_v8, %v883_v8 }
  0x36   :  { %229 = vmatpush.msra.mxu2 %v105_v61  ;;  %190 = vmatmul.f32.vlgmr.msra.gmra.mxu0 %v102_v62  ;;  %v387_v61 = vmul.f32 %v871_v60, %v871_v60  ;;  %v887_v13 = vld [vmem:[#allocation10 + $0xc0] sm:$0xff] }
  0x37   :  { %230 = vmatmul.f32.vlgmr.msra.gmra.mxu2 %v102_v62  ;;  %209 = vmatpush.msra.mxu1 %v136_v63  ;;  %v403_v20 = vadd.f32 %v402_v17, %v372_v16  ;;  %v875_v63 = vld [vmem:[#allocation10 + $0xa8] sm:$0xff]  ;;  %v391_v14 = vmul.f32 %v887_v13, %v887_v13 }
  0x38   :  { %249 = vmatpush.msra.mxu3 %v137_v0  ;;  %210 = vmatmul.f32.vlgmr.msra.gmra.mxu1 %v103_v1  ;;  %v388_v0 = vmul.f32 %v875_v63, %v875_v63  ;;  %v891_v17 = vld [vmem:[#allocation10 + $0xc8] sm:$0xff] }
  0x39   :  { %250 = vmatmul.f32.vlgmr.msra.gmra.mxu3 %v103_v1  ;;  %v404_v23 = vadd.f32 %v403_v20, %v373_v19  ;;  %v392_v19 = vmul.f32 %v891_v17, %v891_v17 }
  0x3b   :  { %v405_v26 = vadd.f32 %v404_v23, %v374_v22  ;;  %v895_v22 = vld [vmem:[#allocation10 + $0xd0] sm:$0xff] }
  0x3c   :  { %v393_v23 = vmul.f32 %v895_v22, %v895_v22 }
  0x3d   :  { %v406_v29 = vadd.f32 %v405_v26, %v375_v25  ;;  %v899_v26 = vld [vmem:[#allocation10 + $0xd8] sm:$0xff] }
  0x3f   :  { %v407_v32 = vadd.f32 %v406_v29, %v376_v28  ;;  %v394_v28 = vmul.f32 %v899_v26, %v899_v26 }
  0x41   :  { %v408_v35 = vadd.f32 %v407_v32, %v377_v31  ;;  %v903_v31 = vld [vmem:[#allocation10 + $0xe0] sm:$0xff] }
  0x42   :  { %v395_v32 = vmul.f32 %v903_v31, %v903_v31 }
  0x43   :  { %v409_v38 = vadd.f32 %v408_v35, %v378_v34  ;;  %v907_v35 = vld [vmem:[#allocation10 + $0xe8] sm:$0xff] }
  0x45   :  { %v410_v41 = vadd.f32 %v409_v38, %v379_v37  ;;  %v396_v37 = vmul.f32 %v907_v35, %v907_v35 }
  0x47   :  { %v411_v44 = vadd.f32 %v410_v41, %v380_v40  ;;  %v365_v40 = vld [vmem:[#allocation10 + $0xf0] sm:$0xff] }
  0x48   :  { %v397_v41 = vmul.f32 %v365_v40, %v365_v40 }
  0x49   :  { %v412_v47 = vadd.f32 %v411_v44, %v381_v43  ;;  %v366_v44 = vld [vmem:[#allocation10 + $0xf8] sm:$0xff] }
  0x4b   :  { %v413_v50 = vadd.f32 %v412_v47, %v382_v46  ;;  %v398_v46 = vmul.f32 %v366_v44, %v366_v44 }
  0x4d   :  { %v414_v53 = vadd.f32 %v413_v50, %v383_v49 }
  0x4f   :  { %v415_v56 = vadd.f32 %v414_v53, %v384_v52 }
  0x51   :  { %v416_v59 = vadd.f32 %v415_v56, %v385_v55 }
  0x53   :  { %v417_v62 = vadd.f32 %v416_v59, %v386_v58 }
  0x55   :  { %v418_v1 = vadd.f32 %v417_v62, %v387_v61 }
  0x57   :  { %v419_v7 = vadd.f32 %v418_v1, %v388_v0  ;;  %v729_v1 = vmov 8.0  }
  0x59   :  { %v420_v11 = vadd.f32 %v419_v7, %v389_v5 }
  0x5b   :  { %v421_v16 = vadd.f32 %v420_v11, %v390_v10  ;;  %v168_v11 = vld [vmem:[#allocation7] sm:$0x3] }
  0x5d   :  { %v422_v20 = vadd.f32 %v421_v16, %v391_v14  ;;  %v436_v16 = vld [vmem:[%s1009_s6] sm:$0x1] }
  0x5f   :  { %v423_v25 = vadd.f32 %v422_v20, %v392_v19 }
  0x61   :  { %v424_v29 = vadd.f32 %v423_v25, %v393_v23  ;;  %v170_v23 = vperm.slane %v168_v11, 0 }
  0x63   :  { %v425_v34 = vadd.f32 %v424_v29, %v394_v28 }
  0x65   :  { %v426_v38 = vadd.f32 %v425_v34, %v395_v32 }
  0x67   :  { %v427_v43 = vadd.f32 %v426_v38, %v396_v37 }
  0x69   :  { %v428_v47 = vadd.f32 %v427_v43, %v397_v41 }
  0x6b   :  { %v429_v49 = vadd.f32 %v428_v47, %v398_v46  ;;  %v171_v46 = vperm.slane %v168_v11, 1 }
  0x6d   :  { %v430_v50 = vrot.slane %v429_v49, 4 }
  0x6f   :  { %v431_v52 = vadd.f32 %v430_v50, %v429_v49 }
  0x71   :  { %v432_v53 = vrot.slane %v431_v52, 2 }
  0x73   :  { %v433_v55 = vadd.f32 %v432_v53, %v431_v52 }
  0x75   :  { %v434_v56 = vrot.slane %v433_v55, 1 }
  0x77   :  { %v435_v58 = vadd.f32 %v434_v56, %v433_v55 }
  0x79   :  { %v437_v59 = vmax.f32 %v435_v58, 1e-24 }
  0x7b   :  { %560 = vrsqrt.f32 %v437_v59  ;;  %vm444_vm0 = vweird.f32 %v437_v59 }
  0x7c   :  { %562 = vrcp.f32 %v729_v1 }
  0x81   :  { %v561_v61 = vpop.eup %560 }
  0x82   :  { %v439_v62 = vmul.f32 %v561_v61, %v437_v59  ;;  %vm445_vm1 = vweird.f32 %v561_v61  ;;  %v563_v14 = vpop.eup %562 }
  0x83   :  { %vm446_vm2 = vmor %vm444_vm0, %vm445_vm1  ;;  %v267_v25 = vmul.f32 8.0, %v563_v14  ;;  %vm271_vm3 = vweird.f32 %v563_v14 }
  0x84   :  { %v440_v0 = vmul.f32 %v561_v61, %v439_v62 }
  0x85   :  { %v268_v38 = vsub.f32 1.0, %v267_v25 }
  0x86   :  { %v441_v5 = vmul.f32 0.5, %v440_v0 }
  0x87   :  { %v269_v50 = vmul.f32 %v563_v14, %v268_v38 }
  0x88   :  { %v442_v7 = vsub.f32 1.5, %v441_v5 }
  0x89   :  { %v270_v62 = vadd.f32 %v563_v14, %v269_v50 }
  0x8a   :  { %v443_v10 = vmul.f32 %v561_v61, %v442_v7 }
  0x8c   :  { %v447_v19 = vsel %vm446_vm2, %v561_v61, %v443_v10 }
  0x8d   :  { %v448_v20 = vmul.f32 %v447_v19, %v436_v16 }
  0x8f   :  { %v914_v28 = vperm.slane %v448_v20, 0 }
  0x91   :  { %v467_v32 = vmul.f32 %v914_v28, %v851_v45  ;;  %v466_v41 = vmul.f32 %v914_v28, %v847_v42  ;;  %v465_v47 = vmul.f32 %v914_v28, %v843_v39  ;;  %v464_v45 = vmul.f32 %v914_v28, %v839_v36 }
  0x92   :  { %v483_v53 = vmul.f32 %v914_v28, %v366_v44  ;;  %v463_v42 = vmul.f32 %v914_v28, %v835_v33  ;;  %v482_v59 = vmul.f32 %v914_v28, %v365_v40  ;;  %v462_v36 = vmul.f32 %v914_v28, %v831_v30 }
  0x93   :  { %488 = vmatpush.msrb.mxu0 %v467_v32  ;;  %v481_v44 = vmul.f32 %v914_v28, %v907_v35  ;;  %v461_v33 = vmul.f32 %v914_v28, %v827_v27  ;;  %v480_v40 = vmul.f32 %v914_v28, %v903_v31  ;;  %v460_v10 = vmul.f32 %v914_v28, %v823_v24 }
  0x94   :  { %508 = vmatpush.msrb.mxu1 %v483_v53  ;;  %v479_v30 = vmul.f32 %v914_v28, %v899_v26  ;;  %v940_v35 = vsel %vm271_vm3, %v563_v14, %v270_v62  ;;  %v459_v11 = vmul.f32 %v914_v28, %v819_v21  ;;  %v478_v27 = vmul.f32 %v914_v28, %v895_v22 }
  0x95   :  { %489 = vmatpush.msrb.mxu0 %v466_v41  ;;  %v458_v24 = vmul.f32 %v914_v28, %v815_v18  ;;  %v477_v26 = vmul.f32 %v914_v28, %v891_v17  ;;  %v457_v21 = vmul.f32 %v914_v28, %v811_v15  ;;  %v476_v22 = vmul.f32 %v914_v28, %v887_v13 }
  0x96   :  { %509 = vmatpush.msrb.mxu1 %v482_v59  ;;  %v456_v18 = vmul.f32 %v914_v28, %v807_v12  ;;  %v475_v17 = vmul.f32 %v914_v28, %v883_v8  ;;  %v455_v15 = vmul.f32 %v914_v28, %v803_v9  ;;  %v474_v13 = vmul.f32 %v914_v28, %v879_v4 }
  0x97   :  { %490 = vmatpush.msrb.mxu0 %v465_v47  ;;  %v454_v12 = vmul.f32 %v914_v28, %v799_v6  ;;  %v473_v8 = vmul.f32 %v914_v28, %v875_v63  ;;  %v453_v9 = vmul.f32 %v914_v28, %v793_v3  ;;  %v472_v4 = vmul.f32 %v914_v28, %v871_v60 }
  0x98   :  { %510 = vmatpush.msrb.mxu1 %v481_v44  ;;  %v452_v6 = vmul.f32 %v914_v28, %v791_v2  ;;  %v471_v63 = vmul.f32 %v914_v28, %v867_v57  ;;  %v470_v60 = vmul.f32 %v914_v28, %v863_v54  ;;  %v468_v2 = vmul.f32 %v914_v28, %v855_v48  ;;  %v315_v48 = vld [vmem:[%s1006_s3] sm:$0x3] }
  0x99   :  { %491 = vmatpush.msrb.mxu0 %v464_v45  ;;  %v469_v45 = vmul.f32 %v914_v28, %v859_v51  ;;  %v317_v44 = vperm.slane %v315_v48, 0 }
  0x9a   :  { %511 = vmatpush.msrb.mxu1 %v480_v40  ;;  %v327_v40 = vld [vmem:[#allocation8] sm:$0x3] }
  0x9b   :  { %492 = vmatpush.msrb.mxu0 %v463_v42 }
  0x9c   :  { %512 = vmatpush.msrb.mxu1 %v479_v30 }
  0x9d   :  { %493 = vmatpush.msrb.mxu0 %v462_v36 }
  0x9e   :  { %513 = vmatpush.msrb.mxu1 %v478_v27 }
  0x9f   :  { %494 = vmatpush.msrb.mxu0 %v461_v33 }
  0xa0   :  { %514 = vmatpush.msrb.mxu1 %v477_v26 }
  0xa1   :  { %495 = vmatpush.msrb.mxu0 %v460_v10 }
  0xa2   :  { %515 = vmatpush.msrb.mxu1 %v476_v22 }
  0xa3   :  { %496 = vmatpush.msrb.mxu0 %v459_v11  ;;  %v318_v11 = vperm.slane %v315_v48, 1 }
  0xa4   :  { %516 = vmatpush.msrb.mxu1 %v475_v17 }
  0xa5   :  { %497 = vmatpush.msrb.mxu0 %v458_v24 }
  0xa6   :  { %517 = vmatpush.msrb.mxu1 %v474_v13 }
  0xa7   :  { %498 = vmatpush.msrb.mxu0 %v457_v21 }
  0xa8   :  { %518 = vmatpush.msrb.mxu1 %v473_v8 }
  0xa9   :  { %499 = vmatpush.msrb.mxu0 %v456_v18 }
  0xaa   :  { %519 = vmatpush.msrb.mxu1 %v472_v4 }
  0xab   :  { %500 = vmatpush.msrb.mxu0 %v455_v15 }
  0xac   :  { %520 = vmatpush.msrb.mxu1 %v471_v63 }
  0xad   :  { %501 = vmatpush.msrb.mxu0 %v454_v12 }
  0xae   :  { %521 = vmatpush.msrb.mxu1 %v470_v60 }
  0xaf   :  { %502 = vmatpush.msrb.mxu0 %v453_v9 }
  0xb0   :  { %522 = vmatpush.msrb.mxu1 %v469_v45 }
  0xb1   :  { %503 = vmatpush.msrb.mxu0 %v452_v6 }
  0xb2   :  { %523 = vmatpush.msrb.mxu1 %v468_v2 }
  0xb3   :  { %v191_v29 = vpop.f32.mrf.mxu0 }
  0xb4   :  { %v192_v34 = vadd.f32 %v191_v29, %v170_v23 }
  0xb5   :  { %v211_v37 = vpop.f32.mrf.mxu1 }
  0xb6   :  { %v212_v43 = vadd.f32 %v211_v37, %v192_v34 }
  0xb8   :  { %v254_v49 = vrot.slane %v212_v43, 4 }
  0xba   :  { %v231_v52 = vpop.f32.mrf.mxu2  ;;  %v255_v55 = vadd.f32 %v254_v49, %v212_v43 }
  0xbb   :  { %v232_v56 = vadd.f32 %v231_v52, %v171_v46 }
  0xbc   :  { %v251_v58 = vpop.f32.mrf.mxu3  ;;  %v256_v39 = vrot.slane %v255_v55, 2 }
  0xbd   :  { %v252_v61 = vadd.f32 %v251_v58, %v232_v56 }
  0xbe   :  { %v257_v0 = vadd.f32 %v256_v39, %v255_v55 }
  0xbf   :  { %v260_v1 = vrot.slane %v252_v61, 4 }
  0xc0   :  { %v258_v5 = vrot.slane %v257_v0, 1 }
  0xc1   :  { %v261_v7 = vadd.f32 %v260_v1, %v252_v61 }
  0xc2   :  { %v259_v16 = vadd.f32 %v258_v5, %v257_v0 }
  0xc3   :  { %v262_v31 = vrot.slane %v261_v7, 2 }
  0xc4   :  { %v273_v14 = vmul.f32 %v940_v35, %v259_v16 }
  0xc5   :  { %v263_v19 = vadd.f32 %v262_v31, %v261_v7 }
  0xc6   :  { %v955_v20 = vsub.f32 %v212_v43, %v273_v14 }
  0xc7   :  { %v264_v23 = vrot.slane %v263_v19, 1 }
  0xc8   :  { %v277_v25 = vmul.f32 %v955_v20, %v955_v20 }
  0xc9   :  { %v265_v29 = vadd.f32 %v264_v23, %v263_v19  ;;  %v330_v19 = vperm.slane %v327_v40, 1  ;;  %v559_v23 = vld [vmem:[%s1010_s7] ss:$0 sm:$0xff] }
  0xca   :  { %v279_v32 = vrot.slane %v277_v25, 4 }
  0xcb   :  { %v274_v34 = vmul.f32 %v940_v35, %v265_v29 }
  0xcc   :  { %v280_v37 = vadd.f32 %v279_v32, %v277_v25 }
  0xcd   :  { %v972_v38 = vsub.f32 %v252_v61, %v274_v34 }
  0xce   :  { %v281_v41 = vrot.slane %v280_v37, 2 }
  0xcf   :  { %v278_v43 = vmul.f32 %v972_v38, %v972_v38 }
  0xd0   :  { %v282_v46 = vadd.f32 %v281_v41, %v280_v37 }
  0xd1   :  { %v285_v47 = vrot.slane %v278_v43, 4 }
  0xd2   :  { %v283_v3 = vrot.slane %v282_v46, 1 }
  0xd3   :  { %v286_v49 = vadd.f32 %v285_v47, %v278_v43 }
  0xd4   :  { %v284_v50 = vadd.f32 %v283_v3, %v282_v46 }
  0xd5   :  { %v287_v52 = vrot.slane %v286_v49, 2 }
  0xd6   :  { %v291_v57 = vmul.f32 %v284_v50, %v940_v35 }
  0xd7   :  { %v288_v53 = vadd.f32 %v287_v52, %v286_v49 }
  0xd8   :  { %v293_v55 = vadd.f32 1e-05, %v291_v57 }
  0xd9   :  { %v289_v56 = vrot.slane %v288_v53, 1 }
  0xda   :  { %564 = vrsqrt.f32 %v293_v55  ;;  %vm301_vm5 = vweird.f32 %v293_v55 }
  0xdb   :  { %v290_v58 = vadd.f32 %v289_v56, %v288_v53 }
  0xdd   :  { %v292_v54 = vmul.f32 %v290_v58, %v940_v35  ;;  %v329_v35 = vperm.slane %v327_v40, 0 }
  0xdf   :  { %v294_v42 = vadd.f32 1e-05, %v292_v54 }
  0xe0   :  { %v565_v59 = vpop.eup %564 }
  0xe1   :  { %566 = vrsqrt.f32 %v294_v42  ;;  %v296_v39 = vmul.f32 %v565_v59, %v293_v55  ;;  %vm302_vm4 = vweird.f32 %v565_v59  ;;  %vm311_vm8 = vweird.f32 %v294_v42 }
  0xe2   :  { %vm303_vm6 = vmor %vm301_vm5, %vm302_vm4 }
  0xe3   :  { %v297_v51 = vmul.f32 %v565_v59, %v296_v39 }
  0xe5   :  { %v298_v61 = vmul.f32 0.5, %v297_v51 }
  0xe7   :  { %v567_v28 = vpop.eup %566  ;;  %v299_v62 = vsub.f32 1.5, %v298_v61 }
  0xe8   :  { %v306_v36 = vmul.f32 %v567_v28, %v294_v42  ;;  %vm312_vm7 = vweird.f32 %v567_v28 }
  0xe9   :  { %v300_v0 = vmul.f32 %v565_v59, %v299_v62  ;;  %vm313_vm9 = vmor %vm311_vm8, %vm312_vm7 }
  0xea   :  { %v307_v1 = vmul.f32 %v567_v28, %v306_v36 }
  0xeb   :  { %v304_v33 = vsel %vm303_vm6, %v565_v59, %v300_v0 }
  0xec   :  { %v308_v5 = vmul.f32 0.5, %v307_v1  ;;  %v321_v7 = vmul.f32 %v317_v44, %v304_v33 }
  0xee   :  { %v309_v10 = vsub.f32 1.5, %v308_v5  ;;  %v323_v30 = vperm.slane %v321_v7, 0 }
  0xf0   :  { %v310_v27 = vmul.f32 %v567_v28, %v309_v10  ;;  %v325_v16 = vmul.f32 %v323_v30, %v955_v20 }
  0xf2   :  { %v314_v31 = vsel %vm313_vm9, %v567_v28, %v310_v27  ;;  %v333_v24 = vadd.f32 %v329_v35, %v325_v16 }
  0xf3   :  { %v322_v26 = vmul.f32 %v318_v11, %v314_v31 }
  0xf4   :  { %504 = vmatmul.f32.vlgmr.msrb.gmra.mxu0 %v333_v24 }
  0xf5   :  { %v324_v14 = vperm.slane %v322_v26, 0 }
  0xf7   :  { %v326_v21 = vmul.f32 %v324_v14, %v972_v38 }
  0xf9   :  { %v334_v22 = vadd.f32 %v330_v19, %v326_v21 }
  0xfb   :  { %524 = vmatmul.f32.vlgmr.msrb.gmra.mxu1 %v334_v22 }
 0x171   :  { %v505_v18 = vpop.f32.mrf.mxu0 }
 0x172   :  { %v506_v20 = vadd.f32 %v559_v23, %v505_v18 }
 0x178   :  { %v525_v17 = vpop.f32.mrf.mxu1 }
 0x179   :  { %v526_v25 = vadd.f32 %v525_v17, %v506_v20 }
 0x17b   :  { %528 = vst [vmem:[#allocation11] sm:$0xff] %v526_v25 }
 0x17c   :  { %539 = dma.vmem_to_hbm [thread:$0]  %s535_s12, 128, %s537_s15, [#allocation4]  }
 0x17d   :  { %718 = dma.done.wait [#allocation4], 128  }
 0x17e   :  { %719 = vsyncadd [#allocation4], 4294967168 }
 0x17f   :  { %544 = vsyncpa [#allocation3], 1 }
 0x180   :  { %545 = vsyncpa [#allocation6], 1 }
 0x181   :  { %546 = vsyncpa [#allocation9], 1 }
 0x182   :  { %547 = vsyncpa [#allocation4], 1 }

</bundles_post_ra>
